<compile_context>
chip_gen: v7x
topology: tpu7x:2x2x1
jax: 0.10.0
libtpu: 0.0.40
codegen_flags: <defaults>
</compile_context>

<pallas_src>
import jax
import jax.numpy as jnp
from jax.experimental import pallas as pl
from jax.experimental.pallas import tpu as pltpu

LANE = 128      # lanes per vreg
SUBLANE = 8     # f32 sublanes per vreg
PAIR = 2 * LANE # 128 interleaved (x0, x1) pairs per packed row


def _round_up(n, m):
    return ((n + m - 1) // m) * m


def _linear_sigmoid_kernel(b_ref, x_ref, w2_ref, o_ref):
    # b_ref : SMEM (1,) f32            -- scalar-prefetched bias
    # x_ref : VMEM (TR, 256) f32       -- 128 interleaved (x0, x1) pairs / row
    # w2_ref: VMEM (256, 128) f32      -- kron(I_128, W^T), fetched once
    # o_ref : VMEM (TR, 128) f32       -- z of the 128 samples of each row
    z = jnp.dot(x_ref[...], w2_ref[...], preferred_element_type=jnp.float32)
    z = z + b_ref[0]
    # sigmoid(z) == 0.5*tanh(0.5*z)+0.5 : single EUP transcendental per element
    o_ref[...] = 0.5 * jnp.tanh(0.5 * z) + 0.5


def simple_model_forward(x, weight, bias, *, block_rows=4096):
    """x: (B, 2) f32; weight: (1, 2) f32 (PyTorch nn.Linear layout); bias: (1,)."""
    B, IN = x.shape
    OUT, IN2 = weight.shape
    assert IN == 2 and IN2 == 2 and OUT == 1

    x = x.astype(jnp.float32)
    w = weight.astype(jnp.float32)
    b = bias.astype(jnp.float32).reshape(1)

    # Small-batch fast path: pallas launch + pipeline prologue dominate there;
    # a fused XLA sigmoid(x @ W.T + b) is strictly faster on all generations.
    if B < SUBLANE * LANE:
        return jax.nn.sigmoid(x @ w.T + b)

    # Pack 128 samples per row.  The pad only materializes when B % 128 != 0.
    Bp = _round_up(B, LANE)
    if Bp != B:
        x = jnp.pad(x, ((0, Bp - B), (0, 0)))
    R = Bp // LANE
    x2d = x.reshape(R, PAIR)                 # free row-major reshape, no copy

    # Fused de-interleave + (2->1) contraction matrix: column j picks up
    # w0 * lane(2j) + w1 * lane(2j+1).  Constant per weight; 128 KiB in VMEM.
    w2 = jnp.kron(jnp.eye(LANE, dtype=jnp.float32), w.T)          # (256, 128)

    # Row-block tile: multiple of 8 sublanes, capped by the array extent.
    tr = max(SUBLANE, min(block_rows, (R // SUBLANE) * SUBLANE))
    grid = (pl.cdiv(R, tr),)  # ragged last block OK: per-row op, masked stores

    out = pl.pallas_call(
        _linear_sigmoid_kernel,
        out_shape=jax.ShapeDtypeStruct((R, LANE), jnp.float32),
        grid_spec=pltpu.PrefetchScalarGridSpec(
            num_scalar_prefetch=1,                    # bias -> SMEM, no per-step DMA
            grid=grid,
            in_specs=[
                pl.BlockSpec((tr, PAIR), lambda i, b_ref: (i, 0)),   # x tile
                pl.BlockSpec((PAIR, LANE), lambda i, b_ref: (0, 0)), # w2 (once)
            ],
            out_specs=pl.BlockSpec((tr, LANE), lambda i, b_ref: (i, 0)),
        ),
        compiler_params=pltpu.CompilerParams(
            dimension_semantics=("parallel",),        # shard blocks on v7x's 2 TCs
            vmem_limit_bytes=32 * 1024 * 1024,        # covers v5e's 16 MiB default
        ),
    )(b, x2d, w2)

    return out.reshape(Bp, 1)[:B]


if __name__ == "__main__":
    key = jax.random.PRNGKey(0)
    kx, kw, kb = jax.random.split(key, 3)

    B, IN, OUT = 8192, 2, 1                           # small demo shape (64 KiB in)
    x = jax.random.normal(kx, (B, IN), dtype=jnp.float32)
    # Deterministic init mimicking nn.Linear: uniform(-1/sqrt(IN), 1/sqrt(IN))
    bound = 1.0 / (IN ** 0.5)
    weight = jax.random.uniform(kw, (OUT, IN), minval=-bound, maxval=bound,
                                dtype=jnp.float32)
    bias = jax.random.uniform(kb, (OUT,), minval=-bound, maxval=bound,
                              dtype=jnp.float32)

    # block_rows=32 only to exercise a multi-step pipelined grid at this small
    # demo size; the production default (4096 rows -> ~6 MiB/step) stays above.
    out = simple_model_forward(x, weight, bias, block_rows=32)
    jax.block_until_ready(out)

    # Reference in plain JAX (f32).
    ref = jax.nn.sigmoid(x @ weight.T + bias)
    assert out.shape == (B, OUT)
    # Tolerance bound: if a TPU generation runs the 2-term MXU contraction as a
    # reduced-precision bf16 pass, |d sigmoid| <= 0.25 * 2^-8 * (|w0 x0|+|w1 x1|)
    # < 1e-2 for these inputs; with the native f32 matmul path the error is ~1e-7.
    assert jnp.allclose(out, ref, atol=1e-2, rtol=0.0), \
        float(jnp.max(jnp.abs(out - ref)))
    print("KERNEL_OK")
</pallas_src>

<mosaic_0001>
module attributes {stable_mosaic.version = 11 : i64} {
  func.func @_linear_sigmoid_kernel(%arg0: i32, %arg1: memref<1xf32, #tpu.memory_space<smem>>, %arg2: memref<32x256xf32, #tpu.memory_space<vmem>>, %arg3: memref<256x128xf32, #tpu.memory_space<vmem>>, %arg4: memref<32x128xf32, #tpu.memory_space<vmem>>) attributes {dimension_semantics = [#tpu.dimension_semantics<parallel>], iteration_bounds = array<i64: 2>, scalar_prefetch = 1 : i64, scratch_operands = 0 : i64, tpu.core_type = #tpu.core_type<tc>, window_params = [{transform_indices = @transform_0, window_bounds = array<i64: 32, 256>}, {pipeline_mode = #tpu.pipeline_mode<synchronous>, transform_indices = @transform_1, window_bounds = array<i64: 256, 128>}, {transform_indices = @transform_2, window_bounds = array<i64: 32, 128>}]} {
    %c0 = arith.constant 0 : index
    %c0_0 = arith.constant 0 : index
    %0 = vector.load %arg2[%c0, %c0_0] : memref<32x256xf32, #tpu.memory_space<vmem>>, vector<32x256xf32>
    %c0_1 = arith.constant 0 : index
    %c0_2 = arith.constant 0 : index
    %1 = vector.load %arg3[%c0_1, %c0_2] : memref<256x128xf32, #tpu.memory_space<vmem>>, vector<256x128xf32>
    %cst = arith.constant dense<0.000000e+00> : vector<32x128xf32>
    %2 = tpu.matmul %0, %1, %cst {dimension_numbers = #tpu.dot_dimension_numbers<[1], [0], [0], [1], [0, 0, 1, 1], [], []>} : vector<32x256xf32>, vector<256x128xf32>, vector<32x128xf32> -> vector<32x128xf32>
    %c0_3 = arith.constant 0 : index
    %3 = memref.load %arg1[%c0_3] : memref<1xf32, #tpu.memory_space<smem>>
    %4 = vector.broadcast %3 : f32 to vector<32x128xf32>
    %5 = arith.addf %2, %4 : vector<32x128xf32>
    %cst_4 = arith.constant 5.000000e-01 : f32
    %6 = vector.broadcast %cst_4 : f32 to vector<32x128xf32>
    %7 = arith.mulf %6, %5 : vector<32x128xf32>
    %8 = math.tanh %7 : vector<32x128xf32>
    %cst_5 = arith.constant 5.000000e-01 : f32
    %9 = vector.broadcast %cst_5 : f32 to vector<32x128xf32>
    %10 = arith.mulf %9, %8 : vector<32x128xf32>
    %cst_6 = arith.constant 5.000000e-01 : f32
    %11 = vector.broadcast %cst_6 : f32 to vector<32x128xf32>
    %12 = arith.addf %10, %11 : vector<32x128xf32>
    %c0_7 = arith.constant 0 : index
    %c0_8 = arith.constant 0 : index
    %13 = vector.load %arg4[%c0_7, %c0_8] : memref<32x128xf32, #tpu.memory_space<vmem>>, vector<32x128xf32>
    tpu.vector_store %arg4[%c0_7, %c0_8], %12 {strides = array<i32>} : memref<32x128xf32, #tpu.memory_space<vmem>>, vector<32x128xf32>,
    return
  }
  func.func @transform_0(%arg0: i32, %arg1: memref<1xf32, #tpu.memory_space<smem>>) -> (i32, i32) {
    %c0_i32 = arith.constant 0 : i32
    %c0_i32_0 = arith.constant 0 : i32
    return %arg0, %c0_i32 : i32, i32
  }
  func.func @transform_1(%arg0: i32, %arg1: memref<1xf32, #tpu.memory_space<smem>>) -> (i32, i32) {
    %c0_i32 = arith.constant 0 : i32
    %c0_i32_0 = arith.constant 0 : i32
    %c0_i32_1 = arith.constant 0 : i32
    return %c0_i32, %c0_i32_0 : i32, i32
  }
  func.func @transform_2(%arg0: i32, %arg1: memref<1xf32, #tpu.memory_space<smem>>) -> (i32, i32) {
    %c0_i32 = arith.constant 0 : i32
    %c0_i32_0 = arith.constant 0 : i32
    return %arg0, %c0_i32 : i32, i32
  }
}

</mosaic_0001>

<bundles_post_ra>
// kernel: tpu_custom_call.1
= control target key start
LH: loop header
LB: loop body
LE: loop exit
PB: predicated region body
PF: predicated region fallthrough
CT: control target
= control target key end

     0   :  { %s983_s0 = inlined_call_operand.<no memory space> [shape: f32[1], index: 0, kind: input, shape index: {}]   ;;  %s984_s1 = inlined_call_operand.hbm [shape: f32[64,256], index: 1, kind: input, shape index: {}]   ;;  %s985_s2 = inlined_call_operand.hbm [shape: f32[256,128], index: 2, kind: input, shape index: {}]   ;;  %s986_s3 = inlined_call_operand.hbm [shape: f32[64,128], index: 3, kind: output, shape index: {}]  }
   0x1   :  { %8 = sst [smem:[#allocation3]] %s983_s0 }
   0x2   :  { %9 = vsyncpa [#allocation5], 0 }
   0x3   :  { %11 = vsyncpa [#allocation5 + $0x1], 0 }
   0x4   :  { %12 = vsyncpa [#allocation8], 0 }
   0x5   :  { %13 = vsyncpa [#allocation6], 0 }
   0x6   :  { %15 = vsyncpa [#allocation6 + $0x1], 0  ;;  %s771_s14 = smov 0   ;;  %s773_s15 = smov 0  }
   0x7   :  { %s775_s16 = smov 0   ;;  %s777_s17 = smov 0  }
   0x8 LB: > { %s792_s0 = sadd.s32 4294967295, %s737_s17   ;;  %s426_s18 = sadd.s32 4294967294, %s737_s17   ;;  %s737_s17 = sphi %s777_s17, %s1006_s17   ;;  %s733_s16 = sphi %s775_s16, %s1005_s16   ;;  %s729_s15 = sphi %s773_s15, %s1004_s15   ;;  %s725_s14 = sphi %s771_s14, %s1003_s14  }
   0x9   : > { %p41_p0 = scmp.ne.s32.totalorder %s729_s15, %s725_s14  ;;  %p987_p1 = scmp.eq.s32.totalorder %s792_s0, 0 }
   0xa   : > { %p92_p3 = scmp.eq.s32.totalorder %s426_s18, 1  ;;  %p427_p5 = scmp.ge.s32.totalorder %s737_s17, 1 }
   0xb   : > { %p801_p4 = por %p987_p1, %p41_p0  ;;  %p99_p7 = scmp.lt.s32.totalorder %s737_s17, 3 }
   0xc   : > { %p806_p6 = por %p92_p3, %p41_p0  ;;  %s739_s22 = smov [#allocation7]  }
   0xd   : > { %s990_s19 = scalar_select %p801_p4, 1, 0 }
   0xe   : > { %s991_s20 = scalar_select %p806_p6, 1, 0 }
   0xf   : > { %p811_p8 = pnand %p427_p5, %p99_p7  ;;  %s111_s23 = sshll.u32 %s739_s22, 4  ;;  %s815_s23 = int_to_ptr.vmem [resolvable:$true] %s111_s23 }
  0x10   : > { %s827_s25 = sadd.s32 1, %s737_s17   ;;  %s28_s26 = sadd.s32 1, %s733_s16 }
  0x11   : > { %s992_s21 = scalar_select %p811_p8, 1, 0 }
  0x12   : > { %p546_p9 = pneg %p811_p8  ;;  %s25_s27 = ssub.s32 %s737_s17, %s827_s25 }
  0x13   : > { %s609_s30 = scalar_lea.hbm %s985_s2, 4096 }
  0x14   : > { %p822_p11 = pnand %p546_p9, %p987_p1  ;;  %p610_p12 = scmp.ne.s32.totalorder %s985_s2, %s609_s30 }
  0x15   : > { %p616_p5 = scmp.lt.u32.totalorder %s609_s30, %s985_s2 }
  0x16   : > { %p611_p13 = pneg %p822_p11 }
  0x18   : > { %p612_p0 = pnand %p611_p13, %p610_p12 }
  0x1a   : > { %p613_p3 = pneg %p612_p0 }
  0x1c   : > { %p618_p7 = pnand %p616_p5, %p613_p3 }
  0x1e   : > { %621 = shalt.err (!%p618_p7)
}
  0x1f   : > { %s622_s8 = scalar_lea.vmem %s815_s23, 4096  ;;  %p630_p2 = scmp.lt.s32.totalorder %s815_s23, %s815_s23 }
  0x20   : > { %p623_p9 = scmp.ne.s32.totalorder %s815_s23, %s622_s8  ;;  %p631_p6 = scmp.lt.s32.totalorder %s622_s8, %s622_s8 }
  0x22   : > { %p625_p10 = pnand %p623_p9, %p611_p13  ;;  %p632_p4 = por %p631_p6, %p630_p2 }
  0x24   : > { %p626_p1 = pneg %p625_p10 }
  0x26   : > { %p633_p8 = pnand %p632_p4, %p626_p1 }
  0x28   : > { %636 = shalt.err (!%p633_p8)
}
  0x29   : > { %s740_s9 = smov 128   ;;  %s741_s10 = smov 8  }
  0x2a   : > { %549 = dma.hbm_to_vmem [thread:$0]  (!%p822_p11), %s985_s2, 4096, %s815_s23, [#allocation8], %s740_s9, %s740_s9, %s741_s10  }
  0x2b   : > { %p26_p2 = scmp.eq.s32.totalorder %s25_s27, 0  ;;  %p35_p1 = scmp.ne.s32.totalorder %s733_s16, %s729_s15 }
  0x2c   : > { %p36_p4 = scmp.eq.s32.totalorder %s737_s17, 0  ;;  %p559_p6 = scmp.lt.s32.totalorder %s737_s17, 2 }
  0x2d   : > { %s858_s13 = scalar_select %p26_p2, %s733_s16, %s28_s26  }
  0x2e   : > { %p37_p8 = por %p36_p4, %p35_p1  ;;  %p994_p10 = scmp.eq.s32.totalorder %s792_s0, 1 }
  0x2f   : > { %s125_s22 = sand.u32 1, %s733_s16   ;;  %s444_s28 = sshll.u32 %s737_s17, 10 }
  0x30   : > { %p862_p12 = por %p994_p10, %p35_p1  ;;  %s430_s29 = sshll.u32 %s125_s22, 6 }
  0x31   : > { %s871_s4 = scalar_lea.hbm %s984_s1, %s444_s28  ;;  %s129_s23 = scalar_lea.vmem [#allocation4], %s430_s29 }
  0x32   : > { %s137_s26 = sshll.u32 %s129_s23, 4  ;;  %p873_p11 = pnand %p559_p6, %p37_p8  ;;  %s877_s26 = int_to_ptr.vmem [resolvable:$true] %s137_s26 }
  0x33   : > { %s879_s5 = scalar_lea.sflag [#allocation5], %s125_s22  ;;  %s637_s6 = scalar_lea.hbm %s871_s4, 1024 }
  0x34   : > { %p638_p13 = scmp.ne.s32.totalorder %s871_s4, %s637_s6  ;;  %p639_p0 = pneg %p873_p11 }
  0x35   : > { %s642_s9 = scalar_lea.hbm %s984_s1, 2048  ;;  %p643_p7 = scmp.lt.u32.totalorder %s871_s4, %s984_s1 }
  0x36   : > { %p640_p3 = pnand %p639_p0, %p638_p13  ;;  %p644_p9 = scmp.lt.u32.totalorder %s642_s9, %s637_s6 }
  0x37   : > { %p646_p1 = scmp.lt.u32.totalorder %s637_s6, %s871_s4 }
  0x38   : > { %p641_p5 = pneg %p640_p3  ;;  %p645_p2 = por %p644_p9, %p643_p7 }
  0x3a   : > { %p647_p4 = por %p646_p1, %p645_p2 }
  0x3c   : > { %p648_p6 = pnand %p647_p4, %p641_p5 }
  0x3e   : > { %651 = shalt.err (!%p648_p6)
}
  0x3f   : > { %s652_s12 = scalar_lea.vmem %s877_s26, 1024  ;;  %s742_s22 = smov [#allocation4]  }
  0x40   : > { %p653_p8 = scmp.ne.s32.totalorder %s877_s26, %s652_s12  ;;  %s657_s28 = sshll.u32 %s742_s22, 4  ;;  %s658_s28 = int_to_ptr.vmem [resolvable:$false] %s657_s28 }
  0x41   : > { %s659_s29 = scalar_lea.vmem %s658_s28, 2048  ;;  %p660_p3 = scmp.lt.s32.totalorder %s877_s26, %s658_s28 }
  0x42   : > { %p655_p10 = pnand %p653_p8, %p639_p0  ;;  %p661_p7 = scmp.lt.s32.totalorder %s659_s29, %s652_s12 }
  0x44   : > { %p656_p13 = pneg %p655_p10  ;;  %p662_p9 = por %p661_p7, %p660_p3 }
  0x46   : > { %p663_p2 = pnand %p662_p9, %p656_p13 }
  0x48   : > { %666 = shalt.err (!%p663_p2)
}
  0x49   : > { %s743_s24 = smov 256   ;;  %s744_s30 = smov 16  }
  0x4a   : > { %553 = dma.hbm_to_vmem [thread:$0]  (!%p873_p11), %s871_s4, 1024, %s877_s26, %s879_s5, %s743_s24, %s743_s24, %s744_s30  }
  0x4b   : > { %p997_p0 = scmp.ne.s32.totalorder %s992_s21, 0 }
  0x4c   : > { %s910_s23 = sand.u32 (!%p997_p0), 1, %s729_s15   ;;  %p998_p5 = scmp.ne.s32.totalorder (!%p997_p0), %s990_s19, 0 }
  0x4d   : > { %149 = sbr.rel (%p997_p0) target bundleno = 377 (0x179), region = 28  ;;  %s435_s6 = sshll.u32 (!%p997_p0), %s910_s23, 6 }
  0x4e   : > { %s152_s7 = scalar_lea.sflag (!%p997_p0), [#allocation5], %s910_s23  ;;  %s914_s8 = scalar_lea.vmem (!%p997_p0), [#allocation4], %s435_s6 }
  0x54   : > { %712 = dma.done.wait (%p998_p5), %s152_s7, 1024  }
  0x55   : > { %714 = vsyncadd (%p998_p5), %s152_s7, 4294966272  ;;  %p999_p11 = scmp.eq.s32.totalorder %s792_s0, 0 }
  0x57   : > { %716 = dma.done.wait (%p999_p11), [#allocation8], 4096   ;;  %p1000_p1 = pmov %p999_p11 }
  0x58   : > { %v206_v0 = vld [vmem:[#allocation7 + $0x80] sm:$0xff]  ;;  %v207_v1 = vld [vmem:[#allocation7 + $0x88] sm:$0xff]  ;;  %v208_v5 = vld [vmem:[#allocation7 + $0x90] sm:$0xff]  ;;  %s222_s19 = sld [smem:[#allocation3]]  ;;  %s437_s21 = sshll.u32 %s910_s23, 5 }
  0x59   : > { %718 = vsyncadd (%p1000_p1), [#allocation8], 4294963200  ;;  %v190_v2 = vld [vmem:[#allocation7] sm:$0xff]  ;;  %v490_v3 = vpack.c.bf16 %v207_v1, %v206_v0  ;;  %v191_v4 = vld [vmem:[#allocation7 + $0x8] sm:$0xff]  ;;  %s179_s4 = scalar_lea.vmem [#allocation9], %s437_s21  ;;  %s445_s27 = sshll.u32 %s792_s0, 9 }
  0x5a   : > { %v209_v6 = vld [vmem:[#allocation7 + $0x98] sm:$0xff]  ;;  %v492_v7 = vpack.c.bf16 %v191_v4, %v190_v2  ;;  %v192_v9 = vld [vmem:[#allocation7 + $0x10] sm:$0xff]  ;;  %v210_v11 = vld [vmem:[#allocation7 + $0xa0] sm:$0xff]  ;;  %s343_s26 = sshll.u32 %s179_s4, 4  ;;  %s939_s10 = scalar_lea.hbm %s986_s3, %s445_s27  ;;  %s934_s26 = int_to_ptr.vmem [resolvable:$true] %s343_s26 }
  0x5b   : > { %v494_v8 = vpack.c.bf16 %v209_v6, %v208_v5  ;;  %v193_v10 = vld [vmem:[#allocation7 + $0x18] sm:$0xff]  ;;  %491 = vmatprep.subr.bf16.mxu0 %v490_v3  ;;  %522 = vmatprep.subr.bf16.mxu1 %v490_v3  ;;  %v211_v12 = vld [vmem:[#allocation7 + $0xa8] sm:$0xff]  ;;  %v194_v15 = vld [vmem:[#allocation7 + $0x20] sm:$0xff]  ;;  %s330_s0 = scalar_lea.sflag [#allocation6], %s910_s23  ;;  %s667_s11 = scalar_lea.vmem %s934_s26, 512 }
  0x5c   : > { %493 = vmatpush3.bf16.msra.mxu0 %v492_v7  ;;  %530 = vmatpush3.bf16.msra.mxu1 %v492_v7  ;;  %v496_v13 = vpack.c.bf16 %v193_v10, %v192_v9  ;;  %v498_v14 = vpack.c.bf16 %v211_v12, %v210_v11  ;;  %v195_v16 = vld [vmem:[#allocation7 + $0x28] sm:$0xff]  ;;  %v212_v17 = vld [vmem:[#allocation7 + $0xb0] sm:$0xff]  ;;  %v213_v18 = vld [vmem:[#allocation7 + $0xb8] sm:$0xff]  ;;  %p668_p4 = scmp.ne.s32.totalorder %s934_s26, %s667_s11  ;;  %s745_s12 = smov [#allocation9]  }
  0x5d   : > { %495 = vmatprep.subr.bf16.mxu0 %v494_v8  ;;  %523 = vmatprep.subr.bf16.mxu1 %v494_v8  ;;  %v500_v19 = vpack.c.bf16 %v195_v16, %v194_v15  ;;  %v502_v20 = vpack.c.bf16 %v213_v18, %v212_v17  ;;  %v196_v21 = vld [vmem:[#allocation7 + $0x30] sm:$0xff]  ;;  %v197_v22 = vld [vmem:[#allocation7 + $0x38] sm:$0xff]  ;;  %v214_v23 = vld [vmem:[#allocation7 + $0xc0] sm:$0xff]  ;;  %s671_s22 = sshll.u32 %s745_s12, 4  ;;  %s672_s22 = int_to_ptr.vmem [resolvable:$false] %s671_s22 }
  0x5e   : > { %v215_v24 = vld [vmem:[#allocation7 + $0xc8] sm:$0xff]  ;;  %v504_v27 = vpack.c.bf16 %v197_v22, %v196_v21  ;;  %v198_v29 = vld [vmem:[#allocation7 + $0x40] sm:$0xff]  ;;  %v216_v31 = vld [vmem:[#allocation7 + $0xd0] sm:$0xff]  ;;  %v223_v58 = vstv %s222_s19  ;;  %p669_p6 = pnand %p668_p4, %p862_p12  ;;  %s673_s28 = scalar_lea.vmem %s672_s22, 1024 }
  0x5f   : > { %v183_v25 = vld [vmem:[%s914_s8 + $0x8] sm:$0xff]  ;;  %v506_v28 = vpack.c.bf16 %v215_v24, %v214_v23  ;;  %v217_v32 = vld [vmem:[#allocation7 + $0xd8] sm:$0xff]  ;;  %v200_v35 = vld [vmem:[#allocation7 + $0x50] sm:$0xff]  ;;  %p674_p10 = scmp.lt.s32.totalorder %s934_s26, %s672_s22  ;;  %p675_p13 = scmp.lt.s32.totalorder %s673_s28, %s667_s11 }
  0x60   : > { %497 = vmatpush3.bf16.msra.mxu0 %v496_v13  ;;  %531 = vmatpush3.bf16.msra.mxu1 %v496_v13  ;;  %v187_v26 = vld [vmem:[%s914_s8 + $0x28] sm:$0xff]  ;;  %v510_v34 = vpack.c.bf16 %v217_v32, %v216_v31  ;;  %v201_v36 = vld [vmem:[#allocation7 + $0x58] sm:$0xff]  ;;  %v218_v37 = vld [vmem:[#allocation7 + $0xe0] sm:$0xff]  ;;  %p670_p8 = pneg %p669_p6 }
  0x61   : > { %499 = vmatprep.subr.bf16.mxu0 %v498_v14  ;;  %524 = vmatprep.subr.bf16.mxu1 %v498_v14  ;;  %v199_v30 = vld [vmem:[#allocation7 + $0x48] sm:$0xff]  ;;  %v512_v39 = vpack.c.bf16 %v201_v36, %v200_v35  ;;  %v202_v41 = vld [vmem:[#allocation7 + $0x60] sm:$0xff]  ;;  %v220_v43 = vld [vmem:[#allocation7 + $0xf0] sm:$0xff]  ;;  %p676_p3 = por %p675_p13, %p674_p10 }
  0x62   : > { %288 = vmatprep.mubr.f32.mxu0 %v183_v25  ;;  %298 = vmatprep.mubr.f32.mxu1 %v187_v26  ;;  %v508_v33 = vpack.c.bf16 %v199_v30, %v198_v29  ;;  %v219_v38 = vld [vmem:[#allocation7 + $0xe8] sm:$0xff]  ;;  %v221_v44 = vld [vmem:[#allocation7 + $0xf8] sm:$0xff]  ;;  %v204_v47 = vld [vmem:[#allocation7 + $0x70] sm:$0xff] }
  0x63   : > { %v514_v40 = vpack.c.bf16 %v219_v38, %v218_v37  ;;  %v203_v42 = vld [vmem:[#allocation7 + $0x68] sm:$0xff]  ;;  %v518_v46 = vpack.c.bf16 %v221_v44, %v220_v43  ;;  %v205_v48 = vld [vmem:[#allocation7 + $0x78] sm:$0xff]  ;;  %v182_v50 = vld [vmem:[%s914_s8] sm:$0xff]  ;;  %p677_p7 = pnand %p676_p3, %p670_p8 }
  0x64   : > { %501 = vmatpush3.bf16.msra.mxu0 %v500_v19  ;;  %532 = vmatpush3.bf16.msra.mxu1 %v500_v19  ;;  %v516_v45 = vpack.c.bf16 %v203_v42, %v202_v41  ;;  %v520_v49 = vpack.c.bf16 %v205_v48, %v204_v47  ;;  %v186_v51 = vld [vmem:[%s914_s8 + $0x20] sm:$0xff]  ;;  %v185_v52 = vld [vmem:[%s914_s8 + $0x18] sm:$0xff]  ;;  %v184_v54 = vld [vmem:[%s914_s8 + $0x10] sm:$0xff] }
  0x65   : > { %503 = vmatprep.subr.bf16.mxu0 %v502_v20  ;;  %525 = vmatprep.subr.bf16.mxu1 %v502_v20  ;;  %v189_v53 = vld [vmem:[%s914_s8 + $0x38] sm:$0xff]  ;;  %v188_v55 = vld [vmem:[%s914_s8 + $0x30] sm:$0xff] }
  0x68   : > { %505 = vmatpush3.bf16.msra.mxu0 %v504_v27  ;;  %533 = vmatpush3.bf16.msra.mxu1 %v504_v27 }
  0x69   : > { %507 = vmatprep.subr.bf16.mxu0 %v506_v28  ;;  %526 = vmatprep.subr.bf16.mxu1 %v506_v28 }
  0x6c   : > { %509 = vmatpush3.bf16.msra.mxu0 %v508_v33  ;;  %534 = vmatpush3.bf16.msra.mxu1 %v508_v33 }
  0x6d   : > { %511 = vmatprep.subr.bf16.mxu0 %v510_v34  ;;  %527 = vmatprep.subr.bf16.mxu1 %v510_v34 }
  0x70   : > { %513 = vmatpush3.bf16.msra.mxu0 %v512_v39  ;;  %535 = vmatpush3.bf16.msra.mxu1 %v512_v39 }
  0x71   : > { %515 = vmatprep.subr.bf16.mxu0 %v514_v40  ;;  %528 = vmatprep.subr.bf16.mxu1 %v514_v40 }
  0x74   : > { %517 = vmatpush3.bf16.msra.mxu0 %v516_v45  ;;  %536 = vmatpush3.bf16.msra.mxu1 %v516_v45 }
  0x75   : > { %519 = vmatprep.subr.bf16.mxu0 %v518_v46  ;;  %529 = vmatprep.subr.bf16.mxu1 %v518_v46 }
  0x78   : > { %521 = vmatpush3.bf16.msra.mxu0 %v520_v49  ;;  %537 = vmatpush3.bf16.msra.mxu1 %v520_v49 }
  0x7b   : > { %289 = vmatmul.mubr.f32.vlgmr.msra.gmra.mrb[0].mxu0 %v182_v50  ;;  %299 = vmatmul.mubr.f32.vlgmr.msra.gmra.mrb[0].mxu1 %v186_v51 }
  0x7c   : > { %293 = vmatprep.mubr.f32.mxu0 %v185_v52  ;;  %303 = vmatprep.mubr.f32.mxu1 %v189_v53 }
  0x7f   : > { %294 = vmatmul.mubr.f32.gmra.mrb[2].mxu0 %v184_v54  ;;  %304 = vmatmul.mubr.f32.gmra.mrb[2].mxu1 %v188_v55 }
 0x14e   : > { %v478_v56 = vpop.f32.mrb[0].mxu0  ;;  %v484_v57 = vpop.f32.mrb[0].mxu1 }
 0x14f   : > { %v479_v59 = vpop.f32.mrb[1].mxu0  ;;  %v485_v60 = vpop.f32.mrb[1].mxu1 }
 0x150   : > { %v480_v61 = vadd.f32 %v479_v59, %v478_v56  ;;  %v486_v62 = vadd.f32 %v485_v60, %v484_v57 }
 0x152   : > { %v291_v63 = vadd.f32 %v480_v61, %v223_v58  ;;  %v301_v0 = vadd.f32 %v486_v62, %v223_v58  ;;  %v481_v1 = vpop.f32.mrb[2].mxu0  ;;  %v487_v2 = vpop.f32.mrb[2].mxu1 }
 0x153   : > { %v482_v3 = vpop.f32.mrb[3].mxu0  ;;  %v488_v4 = vpop.f32.mrb[3].mxu1 }
 0x154   : > { %v309_v5 = vmul.f32 0.5, %v291_v63  ;;  %v311_v6 = vmul.f32 0.5, %v301_v0  ;;  %v483_v7 = vadd.f32 %v482_v3, %v481_v1  ;;  %v489_v8 = vadd.f32 %v488_v4, %v487_v2 }
 0x156   : > { %601 = vtanh.f32 %v309_v5  ;;  %v296_v9 = vadd.f32 %v483_v7, %v223_v58  ;;  %v306_v10 = vadd.f32 %v489_v8, %v223_v58 }
 0x157   : > { %603 = vtanh.f32 %v311_v6 }
 0x158   : > { %v310_v11 = vmul.f32 0.5, %v296_v9  ;;  %v312_v12 = vmul.f32 0.5, %v306_v10 }
 0x15a   : > { %605 = vtanh.f32 %v310_v11 }
 0x15b   : > { %607 = vtanh.f32 %v312_v12 }
 0x160   : > { %v602_v13 = vpop.eup %601 }
 0x161   : > { %v604_v14 = vpop.eup %603  ;;  %v317_v15 = vmul.f32 0.5, %v602_v13 }
 0x162   : > { %v319_v16 = vmul.f32 0.5, %v604_v14 }
 0x163   : > { %v321_v17 = vadd.f32 0.5, %v317_v15 }
 0x164   : > { %v606_v18 = vpop.eup %605  ;;  %v323_v19 = vadd.f32 0.5, %v319_v16 }
 0x165   : > { %v608_v20 = vpop.eup %607  ;;  %325 = vst [vmem:[%s179_s4] sm:$0xff] %v321_v17  ;;  %v318_v21 = vmul.f32 0.5, %v606_v18 }
 0x166   : > { %327 = vst [vmem:[%s179_s4 + $0x10] sm:$0xff] %v323_v19  ;;  %v320_v22 = vmul.f32 0.5, %v608_v20 }
 0x167   : > { %v322_v23 = vadd.f32 0.5, %v318_v21 }
 0x168   : > { %v324_v24 = vadd.f32 0.5, %v320_v22 }
 0x169   : > { %326 = vst [vmem:[%s179_s4 + $0x8] sm:$0xff] %v322_v23 }
 0x16a   : > { %328 = vst [vmem:[%s179_s4 + $0x18] sm:$0xff] %v324_v24 }
 0x16b   : > { %680 = shalt.err (!%p677_p7)
}
 0x16c   : > { %s681_s29 = scalar_lea.hbm %s939_s10, 512  ;;  %s685_s6 = scalar_lea.hbm %s986_s3, 1024 }
 0x16d   : > { %p682_p9 = scmp.ne.s32.totalorder %s939_s10, %s681_s29  ;;  %p686_p5 = scmp.lt.u32.totalorder %s939_s10, %s986_s3 }
 0x16e   : > { %p687_p11 = scmp.lt.u32.totalorder %s685_s6, %s681_s29  ;;  %p689_p4 = scmp.lt.u32.totalorder %s681_s29, %s939_s10 }
 0x16f   : > { %p683_p2 = pnand %p682_p9, %p862_p12 }
 0x170   : > { %p688_p1 = por %p687_p11, %p686_p5 }
 0x171   : > { %p684_p0 = pneg %p683_p2 }
 0x172   : > { %p690_p6 = por %p689_p4, %p688_p1 }
 0x174   : > { %p691_p8 = pnand %p690_p6, %p684_p0 }
 0x176   : > { %694 = shalt.err (!%p691_p8)
}
 0x177   : > { %s746_s19 = smov 128   ;;  %s747_s21 = smov 8  }
 0x178   : > { %544 = dma.vmem_to_hbm [thread:$0]  (%p862_p12), %s934_s26, 512, %s939_s10, %s330_s0, %s746_s19, %s746_s19, %s747_s21  }
 0x179 PF: > { %s358_s4 = sand.u32 1, %s725_s14   ;;  %p1001_p10 = scmp.ne.s32.totalorder %s991_s20, 0 }
 0x17a   : > { %p1002_p13 = scmp.ge.s32.totalorder %s737_s17, 2  ;;  %s359_s27 = scalar_lea.sflag [#allocation6], %s358_s4 }
 0x17c   : > { %p555_p3 = pnand %p1002_p13, %p1001_p10 }
 0x17e   : > { %720 = dma.done.wait (!%p555_p3), %s359_s27, 512  }
 0x17f   : > { %722 = vsyncadd (!%p555_p3), %s359_s27, 4294966784  ;;  %p18_p7 = scmp.ge.s32.totalorder %s827_s25, 4   ;;  %s1003_s14 = smov %s729_s15 }
 0x180   : > { %s1004_s15 = smov %s733_s16  ;;  %s1005_s16 = smov %s858_s13 }
 0x181   : > { %s1006_s17 = smov %s827_s25  ;;  %20 = sbr.rel (!%p18_p7) target bundleno = 8 (0x8), region = 77 }
 0x188   :  { %364 = vsyncpa [#allocation5], 1 }
 0x189   :  { %366 = vsyncpa [#allocation5 + $0x1], 1 }
 0x18a   :  { %367 = vsyncpa [#allocation8], 1 }
 0x18b   :  { %368 = vsyncpa [#allocation6], 1 }
 0x18c   :  { %370 = vsyncpa [#allocation6 + $0x1], 1 }

</bundles_post_ra>
